<compile_context>
chip_gen: v7x
topology: tpu7x:2x2x1
jax: 0.10.0
libtpu: 0.0.40
codegen_flags: <defaults>
</compile_context>

<pallas_src>
import functools

import jax
import jax.numpy as jnp
from jax.experimental import pallas as pl
from jax.experimental.pallas import tpu as pltpu

BN_EPS = 1e-5


# ---------------------------------------------------------------------------
# Kernels
# ---------------------------------------------------------------------------
def _fold_to_lanes(x_f32, lane):
    """Fold (b, C, hw_tile) -> (b, C, lane) with VPU adds over lane-aligned
    static slices (no XLU, no relayout)."""
    hw_tile = x_f32.shape[-1]
    folded = x_f32[:, :, 0:lane]
    for k in range(1, hw_tile // lane):
        folded = folded + x_f32[:, :, k * lane:(k + 1) * lane]
    return folded


def _gap_sum_kernel(x_ref, gap_ref, acc_ref, *, inv_hw, lane):
    """Streaming GAP.  x_ref: (b_tile, C, hw_tile); acc_ref: (b_tile, C, lane)
    f32 scratch; gap_ref: (b_tile, C) f32 written only at the last HW chunk."""
    h = pl.program_id(1)
    folded = _fold_to_lanes(x_ref[...].astype(jnp.float32), lane)

    @pl.when(h == 0)
    def _():
        acc_ref[...] = folded

    @pl.when(h > 0)
    def _():
        acc_ref[...] += folded

    @pl.when(h == pl.num_programs(1) - 1)
    def _():
        # Single cross-lane reduce + relayout, once per B-tile.
        gap_ref[...] = jnp.sum(acc_ref[...], axis=-1) * inv_hw


def _gap_bn_eval_kernel(x_ref, gamma_ref, beta_ref, rmean_ref, rvar_ref,
                        feat_ref, acc_ref, *, inv_hw, lane):
    """Streaming GAP fused with eval-mode BatchNorm1d (running stats)."""
    h = pl.program_id(1)
    folded = _fold_to_lanes(x_ref[...].astype(jnp.float32), lane)

    @pl.when(h == 0)
    def _():
        acc_ref[...] = folded

    @pl.when(h > 0)
    def _():
        acc_ref[...] += folded

    @pl.when(h == pl.num_programs(1) - 1)
    def _():
        gap = jnp.sum(acc_ref[...], axis=-1) * inv_hw
        feat_ref[...] = ((gap - rmean_ref[...])
                         * jax.lax.rsqrt(rvar_ref[...] + BN_EPS)
                         * gamma_ref[...] + beta_ref[...])


def _bn_train_kernel(gap_ref, gamma_ref, beta_ref, feat_ref):
    """Training-mode BatchNorm1d with FULL-batch statistics, computed ONCE.
    gap_ref: (B, C) f32 -> feat_ref: (B, C) bf16 (ready for the MXU matmul)."""
    gap = gap_ref[...]
    mu = jnp.mean(gap, axis=0, keepdims=True)          # sublane reduce (cheap)
    diff = gap - mu
    var = jnp.mean(diff * diff, axis=0, keepdims=True)
    feat = diff * jax.lax.rsqrt(var + BN_EPS) * gamma_ref[...] + beta_ref[...]
    feat_ref[...] = feat.astype(feat_ref.dtype)


def _cls_matmul_kernel(feat_ref, w_ref, cls_ref):
    """Pure bias-free classifier matmul: (B, C) bf16 x (C, n_tile) bf16."""
    cls_ref[...] = jnp.dot(feat_ref[...], w_ref[...],
                           preferred_element_type=jnp.float32)


# ---------------------------------------------------------------------------
# Budgets / tile choosers
# ---------------------------------------------------------------------------
def _round_up(x, m):
    return (x + m - 1) // m * m


def _vmem_budgets():
    """(vmem_limit_ceiling, streaming_budget_for_x_blocks_and_scratch)."""
    try:
        cap = int(pltpu.get_tpu_info().vmem_capacity_bytes)
    except Exception:
        cap = 128 << 20
    if cap <= (64 << 20):            # v7x-class: 64 MiB physical, leave headroom
        return min(48 << 20, int(cap * 0.75)), 24 << 20
    return 96 << 20, 48 << 20        # v5e / v6e: 128 MiB physical


def _pick_hw_tile(hw_pad, cap=1024):
    """Largest multiple of 128 that divides hw_pad and is <= cap."""
    best = 128
    t = 128
    while t <= min(cap, hw_pad):
        if hw_pad % t == 0:
            best = t
        t += 128
    return best


def _pick_b_tile(batch, per_row_bytes, budget_bytes):
    """Largest divisor of batch whose streaming footprint fits the budget
    (down to 1); then halve if needed so the parallel B axis has >= 2 tiles."""
    cap = max(1, budget_bytes // max(1, per_row_bytes))
    cands = [d for d in range(1, batch + 1) if batch % d == 0 and d <= cap]
    b_tile = max(cands)
    if batch >= 2 and batch // b_tile < 2:
        half = [d for d in range(1, batch // 2 + 1)
                if batch % d == 0 and d <= cap]
        if half:
            b_tile = max(half)
    return b_tile


def _pick_n_tile(n_pad):
    """Prefer 256-aligned tiles (2x256^2 MXU); keep >= 2 tiles when possible."""
    n_tile = n_pad
    for t in (1024, 512, 256):
        if n_pad % t == 0:
            n_tile = t
            break
    if n_pad // n_tile < 2 and n_pad // 2 >= 128 and (n_pad // 2) % 128 == 0:
        n_tile = n_pad // 2
    return n_tile


# ---------------------------------------------------------------------------
# Wrapper
# ---------------------------------------------------------------------------
def backbone_head(x, head_params, *, training=True, b_tile=None, hw_tile=None):
    """x: (B, C, H, W) backbone output feature map (NCHW, ideally bf16).
    head_params: output of prepare_head_params()."""
    B, C, H, W = x.shape
    HW = H * W
    x_flat = x.reshape(B, C, HW)

    # Zero-pad the spatial axis to a multiple of 128 (full-width vector loads).
    HW_pad = _round_up(HW, 128)
    if HW_pad != HW:
        x_flat = jnp.pad(x_flat, ((0, 0), (0, 0), (0, HW_pad - HW)))
    itemsize = x_flat.dtype.itemsize
    inv_hw = 1.0 / float(HW)                      # true HW, not padded

    vmem_ceiling, stream_budget = _vmem_budgets()

    if hw_tile is None:
        hw_tile = _pick_hw_tile(HW_pad)
    assert HW_pad % hw_tile == 0 and hw_tile % 128 == 0
    lane = min(128, hw_tile)

    if b_tile is None:
        per_row = C * (2 * hw_tile * itemsize + lane * 4 + 2 * 4)
        b_tile = _pick_b_tile(B, per_row, stream_budget)
    assert B % b_tile == 0
    nb, nh = B // b_tile, HW_pad // hw_tile

    gamma = head_params["bn_gamma"]               # (1, C) f32
    beta = head_params["bn_beta"]
    rmean = head_params["bn_running_mean"]
    rvar = head_params["bn_running_var"]

    # VMEM: double-buffered x block + lane scratch + resident output + params.
    x_block = b_tile * C * hw_tile * itemsize
    acc_block = b_tile * C * lane * 4
    out_block = b_tile * C * 4
    need = 2 * x_block + acc_block + 2 * out_block + 8 * C * 4 + (2 << 20)
    vmem_limit = int(min(max(need, 32 << 20), vmem_ceiling))

    stream_cparams = pltpu.CompilerParams(
        dimension_semantics=("parallel", "arbitrary"),
        vmem_limit_bytes=vmem_limit)
    stream_cost = pl.CostEstimate(
        flops=2 * B * C * HW_pad, transcendentals=0,
        bytes_accessed=B * C * HW_pad * itemsize + B * C * 4)

    x_spec = pl.BlockSpec((b_tile, C, hw_tile), lambda b, h: (b, 0, h))
    par_spec = pl.BlockSpec((1, C), lambda b, h: (0, 0))
    out_spec = pl.BlockSpec((b_tile, C), lambda b, h: (b, 0))
    scratch = [pltpu.VMEM((b_tile, C, lane), jnp.float32)]

    if training:
        # Stage 1: streaming GAP -> global_feat (B, C) f32.
        global_feat = pl.pallas_call(
            functools.partial(_gap_sum_kernel, inv_hw=inv_hw, lane=lane),
            grid=(nb, nh),
            in_specs=[x_spec],
            out_specs=out_spec,
            out_shape=jax.ShapeDtypeStruct((B, C), jnp.float32),
            scratch_shapes=scratch,
            compiler_params=stream_cparams,
            cost_estimate=stream_cost,
        )(x_flat)

        # Stage 2: full-batch BN computed ONCE (hoisted out of the N grid).
        feat_bf16 = pl.pallas_call(
            _bn_train_kernel,
            out_shape=jax.ShapeDtypeStruct((B, C), jnp.bfloat16),
        )(global_feat, gamma, beta)

        # Stage 3: pure bias-free classifier matmul over 256-padded classes.
        w_t = head_params["classifier_w_t_bf16"]          # (C, Npad) bf16
        num_classes = head_params["num_classes"]
        n_pad = w_t.shape[1]
        n_tile = _pick_n_tile(n_pad)

        cls_padded = pl.pallas_call(
            _cls_matmul_kernel,
            grid=(n_pad // n_tile,),
            in_specs=[pl.BlockSpec((B, C), lambda j: (0, 0)),
                      pl.BlockSpec((C, n_tile), lambda j: (0, j))],
            out_specs=pl.BlockSpec((B, n_tile), lambda j: (0, j)),
            out_shape=jax.ShapeDtypeStruct((B, n_pad), jnp.float32),
            compiler_params=pltpu.CompilerParams(
                dimension_semantics=("parallel",)),
        )(feat_bf16, w_t)

        cls_score = cls_padded[:, :num_classes]
        return cls_score, global_feat

    # Eval: streaming GAP fused with running-stat BN; feat is the only output.
    feat = pl.pallas_call(
        functools.partial(_gap_bn_eval_kernel, inv_hw=inv_hw, lane=lane),
        grid=(nb, nh),
        in_specs=[x_spec, par_spec, par_spec, par_spec, par_spec],
        out_specs=out_spec,
        out_shape=jax.ShapeDtypeStruct((B, C), jnp.float32),
        scratch_shapes=scratch,
        compiler_params=stream_cparams,
        cost_estimate=stream_cost,
    )(x_flat, gamma, beta, rmean, rvar)
    return feat


# ---------------------------------------------------------------------------
# Parameters
# ---------------------------------------------------------------------------
def init_params(key, in_planes, num_classes):
    """Mirrors the module's __init__: classifier ~ normal(std=0.001), no bias;
    BatchNorm1d weight=1, bias=0, running stats (0, 1)."""
    w = 0.001 * jax.random.normal(key, (num_classes, in_planes), dtype=jnp.float32)
    return {
        "classifier_w": w,
        "bn_gamma": jnp.ones((in_planes,), jnp.float32),
        "bn_beta": jnp.zeros((in_planes,), jnp.float32),
        "bn_running_mean": jnp.zeros((in_planes,), jnp.float32),
        "bn_running_var": jnp.ones((in_planes,), jnp.float32),
    }


def prepare_head_params(params):
    """One-time prep: transpose classifier weight, pad num_classes to a
    multiple of 256 (MXU-friendly), cast to bf16; BN params to (1, C)."""
    w = params["classifier_w"]                           # (N, C) f32
    n, c = w.shape
    n_pad = max(256, _round_up(n, 256))
    w_t = jnp.zeros((c, n_pad), jnp.bfloat16).at[:, :n].set(
        w.T.astype(jnp.bfloat16))
    return {
        "classifier_w_t_bf16": w_t,
        "num_classes": n,
        "bn_gamma": params["bn_gamma"].reshape(1, c).astype(jnp.float32),
        "bn_beta": params["bn_beta"].reshape(1, c).astype(jnp.float32),
        "bn_running_mean": params["bn_running_mean"].reshape(1, c).astype(jnp.float32),
        "bn_running_var": params["bn_running_var"].reshape(1, c).astype(jnp.float32),
    }


# ---------------------------------------------------------------------------
# Reference (mirrors kernel dtype path: f32 accumulation, bf16 classifier)
# ---------------------------------------------------------------------------
def _reference(x, params, training):
    B, C = x.shape[0], x.shape[1]
    gap = jnp.mean(x.astype(jnp.float32).reshape(B, C, -1), axis=-1)
    if training:
        mu = jnp.mean(gap, axis=0, keepdims=True)
        var = jnp.mean((gap - mu) ** 2, axis=0, keepdims=True)
    else:
        mu = params["bn_running_mean"][None, :]
        var = params["bn_running_var"][None, :]
    feat = ((gap - mu) * jax.lax.rsqrt(var + BN_EPS)
            * params["bn_gamma"][None, :] + params["bn_beta"][None, :])
    w_bf = params["classifier_w"].astype(jnp.bfloat16)
    cls = jnp.dot(feat.astype(jnp.bfloat16), w_bf.T,
                  preferred_element_type=jnp.float32)
    return cls, gap, feat


if __name__ == "__main__":
    key = jax.random.PRNGKey(0)
    k_x, k_x2, k_w = jax.random.split(key, 3)

    # Small stand-in shapes (in_planes would be 2048/1280/... in the real model).
    B, C, H, W, NUM_CLASSES = 16, 32, 16, 16, 8
    x = jax.random.normal(k_x, (B, C, H, W), dtype=jnp.float32).astype(jnp.bfloat16)

    params = init_params(k_w, C, NUM_CLASSES)
    head_params = prepare_head_params(params)

    # Training path (exercise multi-tile grid: 2 B-tiles x 2 HW-chunks).
    cls_score, global_feat = backbone_head(
        x, head_params, training=True, b_tile=8, hw_tile=128)
    # Eval path (auto tiles).
    feat_eval = backbone_head(x, head_params, training=False)
    # Eval path with HW not divisible by 128 (exercises spatial zero-padding).
    x_ragged = jax.random.normal(k_x2, (4, C, 7, 7), dtype=jnp.float32).astype(jnp.bfloat16)
    feat_ragged = backbone_head(x_ragged, head_params, training=False)

    jax.block_until_ready((cls_score, global_feat, feat_eval, feat_ragged))

    ref_cls, ref_gap, _ = _reference(x, params, training=True)
    _, _, ref_feat_eval = _reference(x, params, training=False)
    _, _, ref_feat_ragged = _reference(x_ragged, params, training=False)

    assert cls_score.shape == (B, NUM_CLASSES)
    assert jnp.allclose(global_feat, ref_gap, atol=1e-3, rtol=1e-3), "global_feat mismatch"
    assert jnp.allclose(cls_score, ref_cls, atol=1e-3, rtol=1e-3), "cls_score mismatch"
    assert jnp.allclose(feat_eval, ref_feat_eval, atol=1e-3, rtol=1e-3), "feat mismatch"
    assert jnp.allclose(feat_ragged, ref_feat_ragged, atol=1e-3, rtol=1e-3), "ragged feat mismatch"

    print("KERNEL_OK")
</pallas_src>

<mosaic_0001>
module attributes {stable_mosaic.version = 11 : i64} {
  func.func @_gap_sum_kernel(%arg0: i32, %arg1: i32, %arg2: memref<8x32x128xbf16, #tpu.memory_space<vmem>>, %arg3: memref<8x32xf32, #tpu.memory_space<vmem>>, %arg4: memref<8x32x128xf32, #tpu.memory_space<vmem>>) attributes {dimension_semantics = [#tpu.dimension_semantics<parallel>, #tpu.dimension_semantics<arbitrary>], iteration_bounds = array<i64: 2, 2>, scalar_prefetch = 0 : i64, scratch_operands = 1 : i64, tpu.core_type = #tpu.core_type<tc>, window_params = [{transform_indices = @transform_0, window_bounds = array<i64: 8, 32, 128>}, {transform_indices = @transform_1, window_bounds = array<i64: 8, 32>}]} {
    %c0 = arith.constant 0 : index
    %c0_0 = arith.constant 0 : index
    %c0_1 = arith.constant 0 : index
    %0 = vector.load %arg2[%c0, %c0_0, %c0_1] : memref<8x32x128xbf16, #tpu.memory_space<vmem>>, vector<8x32x128xbf16>
    %1 = arith.extf %0 : vector<8x32x128xbf16> to vector<8x32x128xf32>
    %c0_i32 = arith.constant 0 : i32
    %2 = arith.cmpi eq, %arg1, %c0_i32 : i32
    %3 = arith.extui %2 : i1 to i32
    %c0_i32_2 = arith.constant 0 : i32
    %4 = arith.cmpi ne, %3, %c0_i32_2 : i32
    scf.if %4 {
      %c0_6 = arith.constant 0 : index
      %c0_7 = arith.constant 0 : index
      %c0_8 = arith.constant 0 : index
      %11 = vector.load %arg4[%c0_6, %c0_7, %c0_8] : memref<8x32x128xf32, #tpu.memory_space<vmem>>, vector<8x32x128xf32>
      tpu.vector_store %arg4[%c0_6, %c0_7, %c0_8], %1 {strides = array<i32>} : memref<8x32x128xf32, #tpu.memory_space<vmem>>, vector<8x32x128xf32>,
    } else {
    }
    %c0_i32_3 = arith.constant 0 : i32
    %5 = arith.cmpi sgt, %arg1, %c0_i32_3 : i32
    %6 = arith.extui %5 : i1 to i32
    %c0_i32_4 = arith.constant 0 : i32
    %7 = arith.cmpi ne, %6, %c0_i32_4 : i32
    scf.if %7 {
      %c0_6 = arith.constant 0 : index
      %c0_7 = arith.constant 0 : index
      %c0_8 = arith.constant 0 : index
      %11 = vector.load %arg4[%c0_6, %c0_7, %c0_8] : memref<8x32x128xf32, #tpu.memory_space<vmem>>, vector<8x32x128xf32>
      %12 = arith.addf %11, %1 : vector<8x32x128xf32>
      %c0_9 = arith.constant 0 : index
      %c0_10 = arith.constant 0 : index
      %c0_11 = arith.constant 0 : index
      %13 = vector.load %arg4[%c0_9, %c0_10, %c0_11] : memref<8x32x128xf32, #tpu.memory_space<vmem>>, vector<8x32x128xf32>
      tpu.vector_store %arg4[%c0_9, %c0_10, %c0_11], %12 {strides = array<i32>} : memref<8x32x128xf32, #tpu.memory_space<vmem>>, vector<8x32x128xf32>,
    } else {
    }
    %c1_i32 = arith.constant 1 : i32
    %8 = arith.cmpi eq, %arg1, %c1_i32 : i32
    %9 = arith.extui %8 : i1 to i32
    %c0_i32_5 = arith.constant 0 : i32
    %10 = arith.cmpi ne, %9, %c0_i32_5 : i32
    scf.if %10 {
      %c0_6 = arith.constant 0 : index
      %c0_7 = arith.constant 0 : index
      %c0_8 = arith.constant 0 : index
      %11 = vector.load %arg4[%c0_6, %c0_7, %c0_8] : memref<8x32x128xf32, #tpu.memory_space<vmem>>, vector<8x32x128xf32>
      %cst = arith.constant dense<0.000000e+00> : vector<8x32xf32>
      %12 = vector.multi_reduction <add>, %11, %cst [2] : vector<8x32x128xf32> to vector<8x32xf32>
      %cst_9 = arith.constant 3.906250e-03 : f32
      %13 = vector.broadcast %cst_9 : f32 to vector<8x32xf32>
      %14 = arith.mulf %12, %13 : vector<8x32xf32>
      %c0_10 = arith.constant 0 : index
      %c0_11 = arith.constant 0 : index
      %15 = vector.load %arg3[%c0_10, %c0_11] : memref<8x32xf32, #tpu.memory_space<vmem>>, vector<8x32xf32>
      tpu.vector_store %arg3[%c0_10, %c0_11], %14 {strides = array<i32>} : memref<8x32xf32, #tpu.memory_space<vmem>>, vector<8x32xf32>,
    } else {
    }
    return
  }
  func.func @transform_0(%arg0: i32, %arg1: i32) -> (i32, i32, i32) {
    %c0_i32 = arith.constant 0 : i32
    %c0_i32_0 = arith.constant 0 : i32
    return %arg0, %c0_i32, %arg1 : i32, i32, i32
  }
  func.func @transform_1(%arg0: i32, %arg1: i32) -> (i32, i32) {
    %c0_i32 = arith.constant 0 : i32
    %c0_i32_0 = arith.constant 0 : i32
    return %arg0, %c0_i32 : i32, i32
  }
}

</mosaic_0001>

<bundles_post_ra>
// kernel: tpu_custom_call.1
= control target key start
LH: loop header
LB: loop body
LE: loop exit
PB: predicated region body
PF: predicated region fallthrough
CT: control target
= control target key end

     0   :  { %6 = vsyncpa [#allocation4], 0  ;;  %s1673_s0 = inlined_call_operand.hbm [shape: bf16[16,32,256], index: 0, kind: input, shape index: {}]   ;;  %s1674_s1 = inlined_call_operand.hbm [shape: f32[16,32], index: 1, kind: output, shape index: {}]  }
   0x1   :  { %8 = vsyncpa [#allocation4 + $0x1], 0 }
   0x2   :  { %9 = vsyncpa [#allocation5], 0 }
   0x3   :  { %11 = vsyncpa [#allocation5 + $0x1], 0  ;;  %s1162_s6 = smov 0   ;;  %s1164_s7 = smov 0  }
   0x4   :  { %s1166_s8 = smov 0   ;;  %s1168_s9 = smov 0  }
   0x5   :  { %s1170_s10 = smov 0   ;;  %s1172_s11 = smov 0  }
   0x6   :  { %s1174_s12 = smov 0   ;;  %s1176_s13 = smov 0  }
   0x7   :  { %s1178_s14 = smov 0   ;;  %s1180_s15 = smov 0  }
   0x8   :  { %s1182_s16 = smov 0  }
   0x9 LB: > { %s790_s17 = sadd.s32 4294967295, %s1145_s16   ;;  %s791_s18 = sadd.s32 4294967294, %s1145_s16   ;;  %s1145_s16 = sphi %s1182_s16, %s17_s16   ;;  %s1141_s15 = sphi %s1180_s15, %s1692_s15   ;;  %s1137_s14 = sphi %s1178_s14, %s1691_s14   ;;  %s1133_s13 = sphi %s1176_s13, %s1690_s13   ;;  %s1129_s12 = sphi %s1174_s12, %s1689_s12   ;;  %s1125_s11 = sphi %s1172_s11, %s1688_s11   ;;  %s1121_s10 = sphi %s1170_s10, %s1687_s10   ;;  %s1117_s9 = sphi %s1168_s9, %s1686_s9   ;;  %s1113_s8 = sphi %s1166_s8, %s1685_s8   ;;  %s1109_s7 = sphi %s1164_s7, %s1684_s7   ;;  %s1105_s6 = sphi %s1162_s6, %s1683_s6  }
   0xa   : > { %s26_s19 = sadd.s32 1, %s1137_s14  ;;  %s29_s20 = sadd.s32 1, %s1141_s15 }
   0xb   : > { %p27_p0 = scmp.ge.s32.totalorder %s26_s19, 2  ;;  %s38_s21 = sadd.s32 1, %s1125_s11 }
   0xc   : > { %p45_p1 = scmp.ne.s32.totalorder %s1125_s11, %s1121_s10  ;;  %p46_p2 = scmp.eq.s32.totalorder %s1145_s16, 0 }
   0xd   : > { %s1694_s19 = smov (%p27_p0, %s26_s19), 0  ;;  %s1696_s20 = smov (!%p27_p0, %s29_s20), %s1141_s15 }
   0xe   : > { %s34_s22 = ssub.s32 %s1137_s14, %s1694_s19  ;;  %p1228_p3 = por %p46_p2, %p45_p1 }
   0xf   : > { %p31_p4 = scmp.ge.s32.totalorder %s1696_s20, 2  ;;  %p51_p5 = scmp.ne.s32.totalorder %s1121_s10, %s1117_s9 }
  0x10   : > { %p52_p6 = scmp.eq.s32.totalorder %s790_s17, 0  ;;  %s64_s24 = sadd.s32 1, %s1113_s8 }
  0x11   : > { %s1698_s20 = smov (%p31_p4, %s1696_s20), 0  ;;  %p74_p8 = scmp.ne.s32.totalorder %s1113_s8, %s1109_s7 }
  0x12   : > { %p1236_p7 = por %p52_p6, %p51_p5  ;;  %s33_s26 = ssub.s32 %s1141_s15, %s1698_s20 }
  0x13   : > { %p75_p9 = scmp.eq.s32.totalorder %s790_s17, 3  ;;  %s35_s27 = sor.u32 %s34_s22, %s33_s26 }
  0x14   : > { %p62_p10 = scmp.eq.s32.totalorder %s33_s26, 0  ;;  %p36_p11 = scmp.eq.s32.totalorder %s35_s27, 0 }
  0x15   : > { %p1244_p12 = por %p75_p9, %p74_p8  ;;  %p80_p13 = scmp.ne.s32.totalorder %s1109_s7, %s1105_s6 }
  0x16   : > { %s1249_s29 = scalar_select %p62_p10, %s1113_s8, %s64_s24  }
  0x17   : > { %s1678_s28 = scalar_select %p1244_p12, 1, 0 }
  0x18   : > { %s1252_s30 = scalar_select %p36_p11, %s1125_s11, %s38_s21  }
  0x19   : > { %p81_p0 = scmp.eq.s32.totalorder %s791_s18, 3  ;;  %p900_p1 = scmp.lt.s32.totalorder %s1145_s16, 4 }
  0x1a   : > { %s101_s3 = sand.u32 1, %s1125_s11   ;;  %s808_s5 = sshll.u32 %s1141_s15, 6 }
  0x1b   : > { %p1257_p2 = por %p81_p0, %p80_p13  ;;  %s794_s4 = sshll.u32 %s101_s3, 7 }
  0x1c   : > { %s111_s9 = sadd.s32 %s1137_s14, %s808_s5  ;;  %s105_s17 = scalar_lea.vmem [#allocation3], %s794_s4 }
  0x1d   : > { %s1679_s2 = scalar_select %p1257_p2, 1, 0 }
  0x1e   : > { %s114_s22 = sshll.u32 %s105_s17, 4  ;;  %s797_s26 = sshll.u32 %s111_s9, 6  ;;  %s1264_s22 = int_to_ptr.vmem [resolvable:$true] %s114_s22 }
  0x1f   : > { %s1269_s21 = scalar_lea.hbm %s1673_s0, %s797_s26  ;;  %p1273_p4 = pnand %p900_p1, %p1228_p3 }
  0x20   : > { %s1277_s4 = scalar_lea.sflag [#allocation4], %s101_s3  ;;  %s993_s5 = scalar_lea.hbm %s1269_s21, 2048 }
  0x21   : > { %p994_p5 = scmp.ne.s32.totalorder %s1269_s21, %s993_s5  ;;  %p995_p6 = pneg %p1273_p4 }
  0x22   : > { %s998_s17 = scalar_lea.hbm %s1673_s0, 8192  ;;  %p999_p3 = scmp.lt.u32.totalorder %s1269_s21, %s1673_s0 }
  0x23   : > { %p996_p8 = pnand %p995_p6, %p994_p5  ;;  %p1000_p10 = scmp.lt.u32.totalorder %s998_s17, %s993_s5 }
  0x24   : > { %p1002_p13 = scmp.lt.u32.totalorder %s993_s5, %s1269_s21 }
  0x25   : > { %p997_p9 = pneg %p996_p8  ;;  %p1001_p11 = por %p1000_p10, %p999_p3 }
  0x27   : > { %p1003_p0 = por %p1002_p13, %p1001_p11 }
  0x29   : > { %p1004_p1 = pnand %p1003_p0, %p997_p9 }
  0x2b   : > { %1007 = shalt.err (!%p1004_p1)
}
  0x2c   : > { %s1008_s3 = scalar_lea.vmem %s1264_s22, 2048  ;;  %s1147_s27 = smov [#allocation3]  }
  0x2d   : > { %p1009_p5 = scmp.ne.s32.totalorder %s1264_s22, %s1008_s3  ;;  %s1013_s23 = sshll.u32 %s1147_s27, 4  ;;  %s1014_s23 = int_to_ptr.vmem [resolvable:$false] %s1013_s23 }
  0x2e   : > { %s1015_s9 = scalar_lea.vmem %s1014_s23, 4096  ;;  %p1016_p12 = scmp.lt.s32.totalorder %s1264_s22, %s1014_s23 }
  0x2f   : > { %p1011_p8 = pnand %p1009_p5, %p995_p6  ;;  %p1017_p3 = scmp.lt.s32.totalorder %s1015_s9, %s1008_s3 }
  0x31   : > { %p1012_p2 = pneg %p1011_p8  ;;  %p1018_p10 = por %p1017_p3, %p1016_p12 }
  0x33   : > { %p1019_p11 = pnand %p1018_p10, %p1012_p2 }
  0x35   : > { %1022 = shalt.err (!%p1019_p11)
}
  0x36   : > { %s1148_s5 = smov 128   ;;  %s1149_s17 = smov 64  }
  0x37   : > { %s1150_s26 = smov 4   ;;  %p798_p6 = scmp.ge.s32.totalorder %s1145_s16, 1 }
  0x38   : > { %895 = dma.hbm_to_vmem [thread:$0]  (!%p1273_p4), %s1269_s21, 2048, %s1264_s22, %s1277_s4, %s1148_s5, %s1149_s17, %s1150_s26  }
  0x39   : > { %p122_p9 = scmp.lt.s32.totalorder %s1145_s16, 5 }
  0x3b   : > { %p123_p13 = pnand %p798_p6, %p122_p9 }
  0x3c   : > { %s128_s24 = sand.u32 (!%p123_p13), 1, %s1121_s10  }
  0x3d   : > { %126 = sbr.rel (%p123_p13) target bundleno = 350 (0x15e), region = 24  ;;  %s799_s3 = sshll.u32 (!%p123_p13), %s128_s24, 7 }
  0x3e   : > { %s129_s27 = scalar_lea.sflag (!%p123_p13), [#allocation4], %s128_s24  ;;  %s1308_s23 = scalar_lea.vmem (!%p123_p13), [#allocation3], %s799_s3 }
  0x44   : > { %1096 = dma.done.wait (%p1236_p7), %s129_s27, 2048  }
  0x45   : > { %1098 = vsyncadd (%p1236_p7), %s129_s27, 4294965248  ;;  %s148_s22 = sand.u32 1, %s1109_s7   ;;  %v1320_v0 = vld [vmem:[%s1308_s23] sm:$0xff]   ;;  %v1323_v1 = vld [vmem:[%s1308_s23 + $0x8] sm:$0xff]   ;;  %p801_p7 = scmp.ne.s32.totalorder %s1129_s12, 0 }
  0x46   : > { %s1317_s21 = sshll.u32 %s148_s22, 3  ;;  %v1326_v2 = vld [vmem:[%s1308_s23 + $0x10] sm:$0xff]   ;;  %v811_v3 = vunpack.c.l.bf16 %v1320_v0  ;;  %v812_v4 = vunpack.c.h.bf16 %v1320_v0  ;;  %v815_v5 = vunpack.c.l.bf16 %v1323_v1  ;;  %v816_v6 = vunpack.c.h.bf16 %v1323_v1  ;;  %v1333_v7 = vld [vmem:[%s1308_s23 + $0x18] sm:$0xff]   ;;  %v1336_v8 = vld [vmem:[%s1308_s23 + $0x20] sm:$0xff]  }
  0x47   : > { %v1339_v9 = vld [vmem:[%s1308_s23 + $0x28] sm:$0xff]   ;;  %v819_v10 = vunpack.c.l.bf16 %v1326_v2  ;;  %v820_v11 = vunpack.c.h.bf16 %v1326_v2  ;;  %v823_v12 = vunpack.c.l.bf16 %v1333_v7  ;;  %v824_v13 = vunpack.c.h.bf16 %v1333_v7  ;;  %v1346_v14 = vld [vmem:[%s1308_s23 + $0x30] sm:$0xff]   ;;  %v1349_v15 = vld [vmem:[%s1308_s23 + $0x38] sm:$0xff]   ;;  %s150_s25 = scalar_lea.vmem [#allocation6], %s1317_s21  ;;  %219 = sbr.rel (%p801_p7) target bundleno = 89 (0x59), region = 32 }
  0x48   : > { %v1352_v16 = vld [vmem:[%s1308_s23 + $0x40] sm:$0xff]   ;;  %v827_v17 = vunpack.c.l.bf16 %v1336_v8  ;;  %v828_v18 = vunpack.c.h.bf16 %v1336_v8  ;;  %v831_v19 = vunpack.c.l.bf16 %v1339_v9  ;;  %v832_v20 = vunpack.c.h.bf16 %v1339_v9  ;;  %v1359_v21 = vld [vmem:[%s1308_s23 + $0x48] sm:$0xff]   ;;  %v1362_v22 = vld [vmem:[%s1308_s23 + $0x50] sm:$0xff]   ;;  %220 = vst [vmem:[#allocation2] sm:$0xff] (!%p801_p7), %v811_v3 }
  0x49   : > { %v1365_v23 = vld [vmem:[%s1308_s23 + $0x58] sm:$0xff]   ;;  %v835_v24 = vunpack.c.l.bf16 %v1346_v14  ;;  %v836_v25 = vunpack.c.h.bf16 %v1346_v14  ;;  %v839_v26 = vunpack.c.l.bf16 %v1349_v15  ;;  %v840_v27 = vunpack.c.h.bf16 %v1349_v15  ;;  %v1372_v28 = vld [vmem:[%s1308_s23 + $0x60] sm:$0xff]   ;;  %v1375_v29 = vld [vmem:[%s1308_s23 + $0x68] sm:$0xff]   ;;  %221 = vst [vmem:[#allocation2 + $0x8] sm:$0xff] (!%p801_p7), %v812_v4 }
  0x4a   : > { %v843_v30 = vunpack.c.l.bf16 %v1352_v16  ;;  %v844_v31 = vunpack.c.h.bf16 %v1352_v16  ;;  %v847_v32 = vunpack.c.l.bf16 %v1359_v21  ;;  %v848_v33 = vunpack.c.h.bf16 %v1359_v21  ;;  %v1382_v34 = vld [vmem:[%s1308_s23 + $0x70] sm:$0xff]   ;;  %v1385_v35 = vld [vmem:[%s1308_s23 + $0x78] sm:$0xff]   ;;  %222 = vst [vmem:[#allocation2 + $0x10] sm:$0xff] (!%p801_p7), %v815_v5  ;;  %223 = vst [vmem:[#allocation2 + $0x18] sm:$0xff] (!%p801_p7), %v816_v6 }
  0x4b   : > { %v851_v36 = vunpack.c.l.bf16 %v1362_v22  ;;  %v852_v37 = vunpack.c.h.bf16 %v1362_v22  ;;  %v855_v38 = vunpack.c.l.bf16 %v1365_v23  ;;  %v856_v39 = vunpack.c.h.bf16 %v1365_v23  ;;  %224 = vst [vmem:[#allocation2 + $0x20] sm:$0xff] (!%p801_p7), %v819_v10  ;;  %225 = vst [vmem:[#allocation2 + $0x28] sm:$0xff] (!%p801_p7), %v820_v11 }
  0x4c   : > { %v859_v40 = vunpack.c.l.bf16 %v1372_v28  ;;  %v860_v41 = vunpack.c.h.bf16 %v1372_v28  ;;  %v863_v42 = vunpack.c.l.bf16 %v1375_v29  ;;  %v864_v43 = vunpack.c.h.bf16 %v1375_v29  ;;  %226 = vst [vmem:[#allocation2 + $0x30] sm:$0xff] (!%p801_p7), %v823_v12  ;;  %227 = vst [vmem:[#allocation2 + $0x38] sm:$0xff] (!%p801_p7), %v824_v13 }
  0x4d   : > { %v867_v44 = vunpack.c.l.bf16 %v1382_v34  ;;  %v868_v45 = vunpack.c.h.bf16 %v1382_v34  ;;  %v871_v46 = vunpack.c.l.bf16 %v1385_v35  ;;  %v872_v47 = vunpack.c.h.bf16 %v1385_v35  ;;  %228 = vst [vmem:[#allocation2 + $0x40] sm:$0xff] (!%p801_p7), %v827_v17  ;;  %229 = vst [vmem:[#allocation2 + $0x48] sm:$0xff] (!%p801_p7), %v828_v18 }
  0x4e   : > { %230 = vst [vmem:[#allocation2 + $0x50] sm:$0xff] %v831_v19  ;;  %231 = vst [vmem:[#allocation2 + $0x58] sm:$0xff] %v832_v20 }
  0x4f   : > { %232 = vst [vmem:[#allocation2 + $0x60] sm:$0xff] %v835_v24  ;;  %233 = vst [vmem:[#allocation2 + $0x68] sm:$0xff] %v836_v25 }
  0x50   : > { %234 = vst [vmem:[#allocation2 + $0x70] sm:$0xff] %v839_v26  ;;  %235 = vst [vmem:[#allocation2 + $0x78] sm:$0xff] %v840_v27 }
  0x51   : > { %236 = vst [vmem:[#allocation2 + $0x80] sm:$0xff] %v843_v30  ;;  %237 = vst [vmem:[#allocation2 + $0x88] sm:$0xff] %v844_v31 }
  0x52   : > { %238 = vst [vmem:[#allocation2 + $0x90] sm:$0xff] %v847_v32  ;;  %239 = vst [vmem:[#allocation2 + $0x98] sm:$0xff] %v848_v33 }
  0x53   : > { %240 = vst [vmem:[#allocation2 + $0xa0] sm:$0xff] %v851_v36  ;;  %241 = vst [vmem:[#allocation2 + $0xa8] sm:$0xff] %v852_v37 }
  0x54   : > { %242 = vst [vmem:[#allocation2 + $0xb0] sm:$0xff] %v855_v38  ;;  %243 = vst [vmem:[#allocation2 + $0xb8] sm:$0xff] %v856_v39 }
  0x55   : > { %244 = vst [vmem:[#allocation2 + $0xc0] sm:$0xff] %v859_v40  ;;  %245 = vst [vmem:[#allocation2 + $0xc8] sm:$0xff] %v860_v41 }
  0x56   : > { %246 = vst [vmem:[#allocation2 + $0xd0] sm:$0xff] %v863_v42  ;;  %247 = vst [vmem:[#allocation2 + $0xd8] sm:$0xff] %v864_v43 }
  0x57   : > { %248 = vst [vmem:[#allocation2 + $0xe0] sm:$0xff] %v867_v44  ;;  %249 = vst [vmem:[#allocation2 + $0xe8] sm:$0xff] %v868_v45 }
  0x58   : > { %250 = vst [vmem:[#allocation2 + $0xf0] sm:$0xff] %v871_v46  ;;  %251 = vst [vmem:[#allocation2 + $0xf8] sm:$0xff] %v872_v47 }
  0x59 PF: > { %p802_p12 = scmp.le.s32.totalorder %s1129_s12, 0 }
  0x5a   : > { %v256_v48 = vld [vmem:[#allocation2] sm:$0xff] (!%p802_p12)  ;;  %v274_v14 = vld [vmem:[#allocation2 + $0x90] sm:$0xff] (!%p802_p12) }
  0x5b   : > { %255 = sbr.rel (%p802_p12) target bundleno = 110 (0x6e), region = 36  ;;  %v257_v49 = vld [vmem:[#allocation2 + $0x8] sm:$0xff] (!%p802_p12)  ;;  %v288_v51 = vadd.f32 (!%p802_p12), %v811_v3, %v256_v48  ;;  %v268_v7 = vld [vmem:[#allocation2 + $0x60] sm:$0xff] (!%p802_p12) }
  0x5c   : > { %v258_v50 = vld [vmem:[#allocation2 + $0x10] sm:$0xff] (!%p802_p12)  ;;  %v289_v52 = vadd.f32 (!%p802_p12), %v812_v4, %v257_v49  ;;  %v259_v54 = vld [vmem:[#allocation2 + $0x18] sm:$0xff] (!%p802_p12)  ;;  %v273_v48 = vld [vmem:[#allocation2 + $0x88] sm:$0xff] (!%p802_p12) }
  0x5d   : > { %v290_v53 = vadd.f32 (!%p802_p12), %v815_v5, %v258_v50  ;;  %v260_v55 = vld [vmem:[#allocation2 + $0x20] sm:$0xff] (!%p802_p12)  ;;  %v261_v56 = vld [vmem:[#allocation2 + $0x28] sm:$0xff] (!%p802_p12)  ;;  %v291_v57 = vadd.f32 (!%p802_p12), %v816_v6, %v259_v54  ;;  %320 = vst [vmem:[#allocation2] sm:$0xff] (!%p802_p12), %v288_v51  ;;  %v279_v51 = vld [vmem:[#allocation2 + $0xb8] sm:$0xff] (!%p802_p12) }
  0x5e   : > { %v292_v58 = vadd.f32 (!%p802_p12), %v819_v10, %v260_v55  ;;  %v293_v59 = vadd.f32 (!%p802_p12), %v820_v11, %v261_v56  ;;  %v262_v60 = vld [vmem:[#allocation2 + $0x30] sm:$0xff] (!%p802_p12)  ;;  %v263_v61 = vld [vmem:[#allocation2 + $0x38] sm:$0xff] (!%p802_p12)  ;;  %321 = vst [vmem:[#allocation2 + $0x8] sm:$0xff] (!%p802_p12), %v289_v52  ;;  %v269_v11 = vld [vmem:[#allocation2 + $0x68] sm:$0xff] (!%p802_p12) }
  0x5f   : > { %v264_v62 = vld [vmem:[#allocation2 + $0x40] sm:$0xff] (!%p802_p12)  ;;  %322 = vst [vmem:[#allocation2 + $0x10] sm:$0xff] (!%p802_p12), %v290_v53  ;;  %v294_v63 = vadd.f32 (!%p802_p12), %v823_v12, %v262_v60  ;;  %v295_v0 = vadd.f32 (!%p802_p12), %v824_v13, %v263_v61  ;;  %v265_v3 = vld [vmem:[#allocation2 + $0x48] sm:$0xff] (!%p802_p12)  ;;  %323 = vst [vmem:[#allocation2 + $0x18] sm:$0xff] (!%p802_p12), %v291_v57  ;;  %v300_v13 = vadd.f32 (!%p802_p12), %v835_v24, %v268_v7 }
  0x60   : > { %v296_v1 = vadd.f32 (!%p802_p12), %v827_v17, %v264_v62  ;;  %v266_v4 = vld [vmem:[#allocation2 + $0x50] sm:$0xff] (!%p802_p12)  ;;  %v267_v5 = vld [vmem:[#allocation2 + $0x58] sm:$0xff] (!%p802_p12)  ;;  %324 = vst [vmem:[#allocation2 + $0x20] sm:$0xff] (!%p802_p12), %v292_v58  ;;  %325 = vst [vmem:[#allocation2 + $0x28] sm:$0xff] (!%p802_p12), %v293_v59  ;;  %v297_v2 = vadd.f32 (!%p802_p12), %v828_v18, %v265_v3  ;;  %v301_v17 = vadd.f32 (!%p802_p12), %v836_v25, %v269_v11 }
  0x61   : > { %v298_v6 = vadd.f32 (!%p802_p12), %v831_v19, %v266_v4  ;;  %v299_v10 = vadd.f32 (!%p802_p12), %v832_v20, %v267_v5  ;;  %v270_v12 = vld [vmem:[#allocation2 + $0x70] sm:$0xff] (!%p802_p12)  ;;  %326 = vst [vmem:[#allocation2 + $0x30] sm:$0xff] (!%p802_p12), %v294_v63  ;;  %327 = vst [vmem:[#allocation2 + $0x38] sm:$0xff] (!%p802_p12), %v295_v0  ;;  %v271_v18 = vld [vmem:[#allocation2 + $0x78] sm:$0xff] (!%p802_p12)  ;;  %v305_v24 = vadd.f32 (!%p802_p12), %v844_v31, %v273_v48 }
  0x62   : > { %328 = vst [vmem:[#allocation2 + $0x40] sm:$0xff] %v296_v1  ;;  %v302_v8 = vadd.f32 %v839_v26, %v270_v12  ;;  %v272_v19 = vld [vmem:[#allocation2 + $0x80] sm:$0xff]  ;;  %329 = vst [vmem:[#allocation2 + $0x48] sm:$0xff] %v297_v2  ;;  %v303_v9 = vadd.f32 %v840_v27, %v271_v18  ;;  %v275_v25 = vld [vmem:[#allocation2 + $0x98] sm:$0xff]  ;;  %v306_v26 = vadd.f32 %v847_v32, %v274_v14 }
  0x63   : > { %330 = vst [vmem:[#allocation2 + $0x50] sm:$0xff] %v298_v6  ;;  %331 = vst [vmem:[#allocation2 + $0x58] sm:$0xff] %v299_v10  ;;  %v304_v20 = vadd.f32 %v843_v30, %v272_v19  ;;  %v276_v49 = vld [vmem:[#allocation2 + $0xa0] sm:$0xff]  ;;  %v307_v50 = vadd.f32 %v848_v33, %v275_v25  ;;  %v277_v27 = vld [vmem:[#allocation2 + $0xa8] sm:$0xff]  ;;  %v311_v32 = vadd.f32 %v856_v39, %v279_v51 }
  0x64   : > { %332 = vst [vmem:[#allocation2 + $0x60] sm:$0xff] %v300_v13  ;;  %333 = vst [vmem:[#allocation2 + $0x68] sm:$0xff] %v301_v17  ;;  %v308_v15 = vadd.f32 %v851_v36, %v276_v49  ;;  %v278_v30 = vld [vmem:[#allocation2 + $0xb0] sm:$0xff]  ;;  %v309_v16 = vadd.f32 %v852_v37, %v277_v27  ;;  %v280_v21 = vld [vmem:[#allocation2 + $0xc0] sm:$0xff] }
  0x65   : > { %334 = vst [vmem:[#allocation2 + $0x70] sm:$0xff] %v302_v8  ;;  %335 = vst [vmem:[#allocation2 + $0x78] sm:$0xff] %v303_v9  ;;  %v310_v31 = vadd.f32 %v855_v38, %v278_v30  ;;  %v281_v33 = vld [vmem:[#allocation2 + $0xc8] sm:$0xff]  ;;  %v282_v52 = vld [vmem:[#allocation2 + $0xd0] sm:$0xff]  ;;  %v312_v36 = vadd.f32 %v859_v40, %v280_v21 }
  0x66   : > { %336 = vst [vmem:[#allocation2 + $0x80] sm:$0xff] %v304_v20  ;;  %337 = vst [vmem:[#allocation2 + $0x88] sm:$0xff] %v305_v24  ;;  %v313_v53 = vadd.f32 %v860_v41, %v281_v33  ;;  %v314_v22 = vadd.f32 %v863_v42, %v282_v52  ;;  %v283_v37 = vld [vmem:[#allocation2 + $0xd8] sm:$0xff]  ;;  %v284_v38 = vld [vmem:[#allocation2 + $0xe0] sm:$0xff] }
  0x67   : > { %338 = vst [vmem:[#allocation2 + $0x90] sm:$0xff] %v306_v26  ;;  %339 = vst [vmem:[#allocation2 + $0x98] sm:$0xff] %v307_v50  ;;  %v285_v54 = vld [vmem:[#allocation2 + $0xe8] sm:$0xff]  ;;  %v315_v23 = vadd.f32 %v864_v43, %v283_v37  ;;  %v316_v39 = vadd.f32 %v867_v44, %v284_v38  ;;  %v286_v28 = vld [vmem:[#allocation2 + $0xf0] sm:$0xff] }
  0x68   : > { %340 = vst [vmem:[#allocation2 + $0xa0] sm:$0xff] %v308_v15  ;;  %341 = vst [vmem:[#allocation2 + $0xa8] sm:$0xff] %v309_v16  ;;  %v317_v40 = vadd.f32 %v868_v45, %v285_v54  ;;  %v287_v41 = vld [vmem:[#allocation2 + $0xf8] sm:$0xff]  ;;  %v318_v42 = vadd.f32 %v871_v46, %v286_v28 }
  0x69   : > { %342 = vst [vmem:[#allocation2 + $0xb0] sm:$0xff] %v310_v31  ;;  %343 = vst [vmem:[#allocation2 + $0xb8] sm:$0xff] %v311_v32  ;;  %v319_v55 = vadd.f32 %v872_v47, %v287_v41 }
  0x6a   : > { %344 = vst [vmem:[#allocation2 + $0xc0] sm:$0xff] %v312_v36  ;;  %345 = vst [vmem:[#allocation2 + $0xc8] sm:$0xff] %v313_v53 }
  0x6b   : > { %346 = vst [vmem:[#allocation2 + $0xd0] sm:$0xff] %v314_v22  ;;  %347 = vst [vmem:[#allocation2 + $0xd8] sm:$0xff] %v315_v23 }
  0x6c   : > { %348 = vst [vmem:[#allocation2 + $0xe0] sm:$0xff] %v316_v39  ;;  %349 = vst [vmem:[#allocation2 + $0xe8] sm:$0xff] %v317_v40 }
  0x6d   : > { %350 = vst [vmem:[#allocation2 + $0xf0] sm:$0xff] %v318_v42  ;;  %351 = vst [vmem:[#allocation2 + $0xf8] sm:$0xff] %v319_v55 }
  0x6e PF: > { %p803_p2 = scmp.ne.s32.totalorder %s1129_s12, 1 }
  0x6f   : > { %v368_v58 = vld [vmem:[#allocation2 + $0x60] sm:$0xff] (!%p803_p2)  ;;  %v366_v59 = vld [vmem:[#allocation2 + $0x50] sm:$0xff] (!%p803_p2)  ;;  %v367_v60 = vld [vmem:[#allocation2 + $0x58] sm:$0xff] (!%p803_p2)  ;;  %v516_v31 = vlaneseq (!%p803_p2)  ;;  %vm527_vm0 = vcmask (!%p803_p2), 130112   ;;  %vm534_vm1 = vcmask (!%p803_p2), 195712   ;;  %vm541_vm2 = vcmask (!%p803_p2), 261312  }
  0x70   : > { %355 = sbr.rel (%p803_p2) target bundleno = 325 (0x145), region = 40  ;;  %v356_v34 = vld [vmem:[#allocation2] sm:$0xff] (!%p803_p2)  ;;  %v369_v61 = vld [vmem:[#allocation2 + $0x68] sm:$0xff] (!%p803_p2)  ;;  %v370_v63 = vld [vmem:[#allocation2 + $0x70] sm:$0xff] (!%p803_p2)  ;;  %vm676_vm3 = vcmask (!%p803_p2), 1041409   ;;  %vm678_vm4 = vcmask (!%p803_p2), 1042434  }
  0x71   : > { %388 = vadd.xlane.f32.xlu0 (!%p803_p2), %v356_v34  ;;  %v357_v44 = vld [vmem:[#allocation2 + $0x8] sm:$0xff] (!%p803_p2)  ;;  %v372_v62 = vld [vmem:[#allocation2 + $0x80] sm:$0xff] (!%p803_p2)  ;;  %v371_v0 = vld [vmem:[#allocation2 + $0x78] sm:$0xff] (!%p803_p2)  ;;  %v517_v33 = vand.u32 (!%p803_p2), 127, %v516_v31  ;;  %v519_v52 = vshrl.u32 (!%p803_p2), %v516_v31, 7  ;;  %vm680_vm5 = vcmask (!%p803_p2), 1043459  }
  0x72   : > { %v358_v35 = vld [vmem:[#allocation2 + $0x10] sm:$0xff] (!%p803_p2)  ;;  %v359_v57 = vld [vmem:[#allocation2 + $0x18] sm:$0xff] (!%p803_p2)  ;;  %v373_v1 = vld [vmem:[#allocation2 + $0x88] sm:$0xff] (!%p803_p2)  ;;  %vm682_vm6 = vcmask (!%p803_p2), 1044484   ;;  %vm684_vm7 = vcmask (!%p803_p2), 1045509   ;;  %vm686_vm8 = vcmask (!%p803_p2), 1046534  }
  0x73   : > { %v360_v29 = vld [vmem:[#allocation2 + $0x20] sm:$0xff] (!%p803_p2)  ;;  %v361_v43 = vld [vmem:[#allocation2 + $0x28] sm:$0xff] (!%p803_p2)  ;;  %v374_v4 = vld [vmem:[#allocation2 + $0x90] sm:$0xff] (!%p803_p2)  ;;  %v522_v22 = vadd.s32 (!%p803_p2), 4294967288, %v517_v33  ;;  %v529_v37 = vadd.s32 (!%p803_p2), 4294967280, %v517_v33  ;;  %v536_v38 = vadd.s32 (!%p803_p2), 4294967272, %v517_v33  ;;  %v1533_v54 = vsub.s32 (!%p803_p2), %v517_v33, %v519_v52 }
  0x74   : > { %396 = vadd.xlane.f32.xlu1 (!%p803_p2), %v360_v29  ;;  %v362_v45 = vld [vmem:[#allocation2 + $0x30] sm:$0xff] (!%p803_p2)  ;;  %v363_v56 = vld [vmem:[#allocation2 + $0x38] sm:$0xff] (!%p803_p2)  ;;  %v376_v3 = vld [vmem:[#allocation2 + $0xa0] sm:$0xff] (!%p803_p2)  ;;  %vm688_vm9 = vcmask (!%p803_p2), 1047559   ;;  %vm691_vm10 = vcmask (!%p803_p2), 261120  }
  0x75   : > { %390 = vadd.xlane.f32.xlu0 (!%p803_p2), %v357_v44  ;;  %v365_v46 = vld [vmem:[#allocation2 + $0x48] sm:$0xff] (!%p803_p2)  ;;  %v364_v47 = vld [vmem:[#allocation2 + $0x40] sm:$0xff] (!%p803_p2)  ;;  %v375_v5 = vld [vmem:[#allocation2 + $0x98] sm:$0xff] (!%p803_p2)  ;;  %v1537_v28 = vsub.s32 (!%p803_p2), %v522_v22, %v519_v52  ;;  %v1539_v55 = vsub.s32 (!%p803_p2), %v529_v37, %v519_v52  ;;  %v1541_v44 = vsub.s32 (!%p803_p2), %v536_v38, %v519_v52 }
  0x76   : > { %v377_v2 = vld [vmem:[#allocation2 + $0xa8] sm:$0xff] (!%p803_p2)  ;;  %v380_v6 = vld [vmem:[#allocation2 + $0xc0] sm:$0xff] (!%p803_p2)  ;;  %v378_v10 = vld [vmem:[#allocation2 + $0xb0] sm:$0xff] (!%p803_p2) }
  0x77   : > { %v379_v7 = vld [vmem:[#allocation2 + $0xb8] sm:$0xff]  ;;  %v381_v11 = vld [vmem:[#allocation2 + $0xc8] sm:$0xff]  ;;  %v384_v12 = vld [vmem:[#allocation2 + $0xe0] sm:$0xff] }
  0x78   : > { %398 = vadd.xlane.f32.xlu1 %v361_v43  ;;  %v382_v13 = vld [vmem:[#allocation2 + $0xd0] sm:$0xff]  ;;  %v383_v17 = vld [vmem:[#allocation2 + $0xd8] sm:$0xff]  ;;  %v385_v8 = vld [vmem:[#allocation2 + $0xe8] sm:$0xff] }
  0x79   : > { %392 = vadd.xlane.f32.xlu0 %v358_v35  ;;  %v386_v18 = vld [vmem:[#allocation2 + $0xf0] sm:$0xff]  ;;  %v387_v19 = vld [vmem:[#allocation2 + $0xf8] sm:$0xff] }
  0x7c   : > { %400 = vadd.xlane.f32.xlu1 %v362_v45 }
  0x7d   : > { %404 = vadd.xlane.f32.xlu0 %v364_v47 }
  0x80   : > { %406 = vadd.xlane.f32.xlu1 %v365_v46 }
  0x81   : > { %394 = vadd.xlane.f32.xlu0 %v359_v57 }
  0x84   : > { %402 = vadd.xlane.f32.xlu1 %v363_v56 }
  0x85   : > { %408 = vadd.xlane.f32.xlu0 %v366_v59 }
  0x88   : > { %412 = vadd.xlane.f32.xlu1 %v368_v58 }
  0x89   : > { %414 = vadd.xlane.f32.xlu0 %v369_v61 }
  0x8c   : > { %410 = vadd.xlane.f32.xlu1 %v367_v60 }
  0x8d   : > { %416 = vadd.xlane.f32.xlu0 %v370_v63 }
  0x90   : > { %420 = vadd.xlane.f32.xlu1 %v372_v62 }
  0x91   : > { %422 = vadd.xlane.f32.xlu0 %v373_v1 }
  0x94   : > { %418 = vadd.xlane.f32.xlu1 %v371_v0 }
  0x95   : > { %424 = vadd.xlane.f32.xlu0 %v374_v4 }
  0x98   : > { %428 = vadd.xlane.f32.xlu1 %v376_v3 }
  0x99   : > { %430 = vadd.xlane.f32.xlu0 %v377_v2 }
  0x9c   : > { %426 = vadd.xlane.f32.xlu1 %v375_v5 }
  0x9d   : > { %432 = vadd.xlane.f32.xlu0 %v378_v10 }
  0xa0   : > { %436 = vadd.xlane.f32.xlu1 %v380_v6 }
  0xa1   : > { %438 = vadd.xlane.f32.xlu0 %v381_v11 }
  0xa4   : > { %434 = vadd.xlane.f32.xlu1 %v379_v7 }
  0xa5   : > { %440 = vadd.xlane.f32.xlu0 %v382_v13 }
  0xa8   : > { %444 = vadd.xlane.f32.xlu1 %v384_v12 }
  0xa9   : > { %446 = vadd.xlane.f32.xlu0 %v385_v8 }
  0xac   : > { %442 = vadd.xlane.f32.xlu1 %v383_v17 }
  0xad   : > { %448 = vadd.xlane.f32.xlu0 %v386_v18 }
  0xb0   : > { %450 = vadd.xlane.f32.xlu1 %v387_v19 }
  0xfe   : > { %v389_v9 = vpop.xlane.xlu0 %388 }
  0xff   : > { %v452_v43 = vmul.f32 0.00390625, %v389_v9 }
 0x101   : > { %v397_v48 = vpop.xlane.xlu1 %396  ;;  %v521_v63 = vrot.slane %v452_v43, %v1533_v54 }
 0x102   : > { %v391_v24 = vpop.xlane.xlu0 %390  ;;  %v456_v40 = vmul.f32 0.00390625, %v397_v48 }
 0x103   : > { %v453_v42 = vmul.f32 0.00390625, %v391_v24 }
 0x104   : > { %v546_v56 = vrot.slane %v456_v40, %v1533_v54 }
 0x105   : > { %v399_v20 = vpop.xlane.xlu1 %398  ;;  %v526_v58 = vrot.slane %v453_v42, %v1537_v28 }
 0x106   : > { %v393_v25 = vpop.xlane.xlu0 %392  ;;  %v457_v41 = vmul.f32 0.00390625, %v399_v20 }
 0x107   : > { %v454_v34 = vmul.f32 0.00390625, %v393_v25  ;;  %v528_v6 = vsel %vm527_vm0, %v526_v58, %v521_v63 }
 0x108   : > { %v550_v57 = vrot.slane %v457_v41, %v1537_v28 }
 0x109   : > { %v401_v14 = vpop.xlane.xlu1 %400  ;;  %v533_v60 = vrot.slane %v454_v34, %v1539_v55 }
 0x10a   : > { %v405_v26 = vpop.xlane.xlu0 %404  ;;  %v458_v29 = vmul.f32 0.00390625, %v401_v14  ;;  %v551_v2 = vsel %vm527_vm0, %v550_v57, %v546_v56 }
 0x10b   : > { %v460_v62 = vmul.f32 0.00390625, %v405_v26  ;;  %v535_v11 = vsel %vm534_vm1, %v533_v60, %v528_v6 }
 0x10c   : > { %v555_v59 = vrot.slane %v458_v29, %v1539_v55 }
 0x10d   : > { %v407_v49 = vpop.xlane.xlu1 %406  ;;  %v565_v13 = vrot.slane %v460_v62, %v1533_v54 }
 0x10e   : > { %v395_v15 = vpop.xlane.xlu0 %394  ;;  %v461_v61 = vmul.f32 0.00390625, %v407_v49  ;;  %v556_v7 = vsel %vm534_vm1, %v555_v59, %v551_v2 }
 0x10f   : > { %v455_v35 = vmul.f32 0.00390625, %v395_v15 }
 0x110   : > { %v569_v12 = vrot.slane %v461_v61, %v1537_v28 }
 0x111   : > { %v403_v50 = vpop.xlane.xlu1 %402  ;;  %v540_v1 = vrot.slane %v455_v35, %v1541_v44 }
 0x112   : > { %v409_v30 = vpop.xlane.xlu0 %408  ;;  %v459_v45 = vmul.f32 0.00390625, %v403_v50  ;;  %v570_v25 = vsel %vm527_vm0, %v569_v12, %v565_v13 }
 0x113   : > { %v462_v3 = vmul.f32 0.00390625, %v409_v30  ;;  %v542_v8 = vsel %vm541_vm2, %v540_v1, %v535_v11 }
 0x114   : > { %v560_v0 = vrot.slane %v459_v45, %v1541_v44 }
 0x115   : > { %v413_v27 = vpop.xlane.xlu1 %412  ;;  %v574_v18 = vrot.slane %v462_v3, %v1539_v55 }
 0x116   : > { %v415_v16 = vpop.xlane.xlu0 %414  ;;  %v561_v17 = vsel %vm541_vm2, %v560_v0, %v556_v7  ;;  %v464_v24 = vmul.f32 0.00390625, %v413_v27 }
 0x117   : > { %v465_v19 = vmul.f32 0.00390625, %v415_v16  ;;  %v677_v49 = vsel %vm676_vm3, %v561_v17, %v542_v8  ;;  %v575_v50 = vsel %vm534_vm1, %v574_v18, %v570_v25 }
 0x118   : > { %v584_v22 = vrot.slane %v464_v24, %v1533_v54 }
 0x119   : > { %v411_v51 = vpop.xlane.xlu1 %410  ;;  %v588_v15 = vrot.slane %v465_v19, %v1537_v28 }
 0x11a   : > { %v1531_v21 = vpop.xlane.xlu0 %416  ;;  %v463_v10 = vmul.f32 0.00390625, %v411_v51 }
 0x11b   : > { %v466_v30 = vmul.f32 0.00390625, %v1531_v21  ;;  %v589_v41 = vsel %vm527_vm0, %v588_v15, %v584_v22 }
 0x11c   : > { %v579_v14 = vrot.slane %v463_v10, %v1541_v44 }
 0x11d   : > { %v421_v32 = vpop.xlane.xlu1 %420  ;;  %v593_v42 = vrot.slane %v466_v30, %v1539_v55 }
 0x11e   : > { %v423_v53 = vpop.xlane.xlu0 %422  ;;  %v468_v26 = vmul.f32 0.00390625, %v421_v32  ;;  %v580_v32 = vsel %vm541_vm2, %v579_v14, %v575_v50 }
 0x11f   : > { %v469_v48 = vmul.f32 0.00390625, %v423_v53  ;;  %v594_v0 = vsel %vm534_vm1, %v593_v42, %v589_v41  ;;  %v679_v18 = vsel %vm678_vm4, %v580_v32, %v677_v49 }
 0x120   : > { %v603_v40 = vrot.slane %v468_v26, %v1533_v54 }
 0x121   : > { %v419_v36 = vpop.xlane.xlu1 %418  ;;  %v607_v31 = vrot.slane %v469_v48, %v1537_v28 }
 0x122   : > { %v425_v39 = vpop.xlane.xlu0 %424  ;;  %v467_v16 = vmul.f32 0.00390625, %v419_v36 }
 0x123   : > { %v470_v51 = vmul.f32 0.00390625, %v425_v39  ;;  %v608_v45 = vsel %vm527_vm0, %v607_v31, %v603_v40 }
 0x124   : > { %v598_v43 = vrot.slane %v467_v16, %v1541_v44 }
 0x125   : > { %v1535_v23 = vpop.xlane.xlu1 %428  ;;  %v612_v29 = vrot.slane %v470_v51, %v1539_v55 }
 0x126   : > { %v431_v47 = vpop.xlane.xlu0 %430  ;;  %v472_v21 = vmul.f32 0.00390625, %v1535_v23 }
 0x127   : > { %v473_v33 = vmul.f32 0.00390625, %v431_v47  ;;  %v613_v1 = vsel %vm534_vm1, %v612_v29, %v608_v45 }
 0x128   : > { %v622_v60 = vrot.slane %v472_v21, %v1533_v54 }
 0x129   : > { %v427_v46 = vpop.xlane.xlu1 %426 }
 0x12a   : > { %v433_v5 = vpop.xlane.xlu0 %432  ;;  %v471_v27 = vmul.f32 0.00390625, %v427_v46  ;;  %v626_v46 = vrot.slane %v473_v33, %v1537_v28 }
 0x12b   : > { %v474_v37 = vmul.f32 0.00390625, %v433_v5  ;;  %v599_v5 = vsel %vm541_vm2, %v598_v43, %v594_v0 }
 0x12c   : > { %v617_v35 = vrot.slane %v471_v27, %v1541_v44  ;;  %v627_v6 = vsel %vm527_vm0, %v626_v46, %v622_v60 }
 0x12d   : > { %v437_v4 = vpop.xlane.xlu1 %436  ;;  %v631_v56 = vrot.slane %v474_v37, %v1539_v55 }
 0x12e   : > { %v439_v20 = vpop.xlane.xlu0 %438  ;;  %v476_v34 = vmul.f32 0.00390625, %v437_v4  ;;  %v618_v2 = vsel %vm541_vm2, %v617_v35, %v613_v1 }
 0x12f   : > { %v477_v38 = vmul.f32 0.00390625, %v439_v20  ;;  %v632_v12 = vsel %vm534_vm1, %v631_v56, %v627_v6  ;;  %v681_v20 = vsel %vm680_vm5, %v599_v5, %v679_v18 }
 0x130   : > { %v641_v3 = vrot.slane %v476_v34, %v1533_v54  ;;  %v683_v25 = vsel %vm682_vm6, %v618_v2, %v681_v20 }
 0x131   : > { %v435_v9 = vpop.xlane.xlu1 %434  ;;  %v645_v57 = vrot.slane %v477_v38, %v1537_v28 }
 0x132   : > { %v441_v53 = vpop.xlane.xlu0 %440  ;;  %v475_v39 = vmul.f32 0.00390625, %v435_v9 }
 0x133   : > { %v478_v36 = vmul.f32 0.00390625, %v441_v53  ;;  %v646_v13 = vsel %vm527_vm0, %v645_v57, %v641_v3 }
 0x134   : > { %v636_v61 = vrot.slane %v475_v39, %v1541_v44 }
 0x135   : > { %v445_v52 = vpop.xlane.xlu1 %444  ;;  %v650_v63 = vrot.slane %v478_v36, %v1539_v55 }
 0x136   : > { %v447_v47 = vpop.xlane.xlu0 %446  ;;  %v480_v62 = vmul.f32 0.00390625, %v445_v52  ;;  %v637_v19 = vsel %vm541_vm2, %v636_v61, %v632_v12 }
 0x137   : > { %v481_v59 = vmul.f32 0.00390625, %v447_v47  ;;  %v651_v9 = vsel %vm534_vm1, %v650_v63, %v646_v13  ;;  %v685_v49 = vsel %vm684_vm7, %v637_v19, %v683_v25 }
 0x138   : > { %v660_v48 = vrot.slane %v480_v62, %v1533_v54 }
 0x139   : > { %v443_v23 = vpop.xlane.xlu1 %442  ;;  %v664_v10 = vrot.slane %v481_v59, %v1537_v28 }
 0x13a   : > { %v479_v58 = vmul.f32 0.00390625, %v443_v23  ;;  %v449_v7 = vpop.xlane.xlu0 %448 }
 0x13b   : > { %v482_v17 = vmul.f32 0.00390625, %v449_v7  ;;  %v665_v26 = vsel %vm527_vm0, %v664_v10, %v660_v48 }
 0x13c   : > { %v655_v4 = vrot.slane %v479_v58, %v1541_v44 }
 0x13d   : > { %v451_v11 = vpop.xlane.xlu1 %450  ;;  %v669_v24 = vrot.slane %v482_v17, %v1539_v55 }
 0x13e   : > { %v483_v8 = vmul.f32 0.00390625, %v451_v11  ;;  %v656_v28 = vsel %vm541_vm2, %v655_v4, %v651_v9 }
 0x13f   : > { %v670_v50 = vsel %vm534_vm1, %v669_v24, %v665_v26  ;;  %v687_v54 = vsel %vm686_vm8, %v656_v28, %v685_v49 }
 0x140   : > { %v674_v14 = vrot.slane %v483_v8, %v1541_v44 }
 0x142   : > { %v675_v15 = vsel %vm541_vm2, %v674_v14, %v670_v50 }
 0x143   : > { %v689_v30 = vsel %vm688_vm9, %v675_v15, %v687_v54 }
 0x144   : > { %692 = vst.msk [vmem:[%s150_s25] sm:$0xff] %vm691_vm10, %v689_v30 }
 0x145 PF: > { %s805_s12 = sshll.u32 %s1133_s13, 7  ;;  %s707_s5 = sshll.u32 %s150_s25, 4  ;;  %s708_s5 = int_to_ptr.vmem [resolvable:$true] %s707_s5 }
 0x146   : > { %s1613_s9 = scalar_lea.hbm %s1674_s1, %s805_s12  ;;  %s694_s17 = scalar_lea.sflag [#allocation5], %s148_s22 }
 0x147   : > { %s1023_s26 = scalar_lea.vmem %s708_s5, 128  ;;  %p1681_p0 = scmp.ne.s32.totalorder %s1678_s28, 0 }
 0x148   : > { %p1024_p4 = scmp.ne.s32.totalorder %s708_s5, %s1023_s26  ;;  %s1151_s24 = smov [#allocation6]  }
 0x149   : > { %s1027_s3 = sshll.u32 %s1151_s24, 4  ;;  %s1028_s3 = int_to_ptr.vmem [resolvable:$false] %s1027_s3 }
 0x14a   : > { %p1025_p1 = pnand %p1024_p4, %p1681_p0  ;;  %s1029_s27 = scalar_lea.vmem %s1028_s3, 256 }
 0x14b   : > { %p1030_p8 = scmp.lt.s32.totalorder %s708_s5, %s1028_s3  ;;  %p1031_p3 = scmp.lt.s32.totalorder %s1029_s27, %s1023_s26 }
 0x14c   : > { %p1026_p5 = pneg %p1025_p1 }
 0x14d   : > { %p1032_p10 = por %p1031_p3, %p1030_p8 }
 0x14f   : > { %p1033_p11 = pnand %p1032_p10, %p1026_p5 }
 0x151   : > { %1036 = shalt.err (!%p1033_p11)
}
 0x152   : > { %s1037_s13 = scalar_lea.hbm %s1613_s9, 128  ;;  %s1041_s21 = scalar_lea.hbm %s1674_s1, 256 }
 0x153   : > { %p1038_p6 = scmp.ne.s32.totalorder %s1613_s9, %s1037_s13  ;;  %p1042_p7 = scmp.lt.u32.totalorder %s1613_s9, %s1674_s1 }
 0x154   : > { %p1043_p12 = scmp.lt.u32.totalorder %s1041_s21, %s1037_s13  ;;  %p1045_p4 = scmp.lt.u32.totalorder %s1037_s13, %s1613_s9 }
 0x155   : > { %p1039_p9 = pnand %p1038_p6, %p1681_p0 }
 0x156   : > { %p1044_p2 = por %p1043_p12, %p1042_p7 }
 0x157   : > { %p1040_p13 = pneg %p1039_p9 }
 0x158   : > { %p1046_p1 = por %p1045_p4, %p1044_p2 }
 0x15a   : > { %p1047_p5 = pnand %p1046_p1, %p1040_p13 }
 0x15c   : > { %1050 = shalt.err (!%p1047_p5)
}
 0x15d   : > { %890 = dma.vmem_to_hbm [thread:$0]  (%p1681_p0), %s708_s5, 128, %s1613_s9, %s694_s17  }
 0x15e PF: > { %p901_p8 = scmp.ge.s32.totalorder %s1145_s16, 2  ;;  %s719_s18 = sand.u32 1, %s1105_s6  }
 0x15f   : > { %p1682_p3 = scmp.ne.s32.totalorder %s1679_s2, 0  ;;  %s720_s4 = scalar_lea.sflag [#allocation5], %s719_s18 }
 0x161   : > { %p897_p10 = pnand %p901_p8, %p1682_p3 }
 0x163   : > { %1100 = dma.done.wait (!%p897_p10), %s720_s4, 128  }
 0x164   : > { %1102 = vsyncadd (!%p897_p10), %s720_s4, 4294967168  ;;  %s17_s16 = sadd.s32 1, %s1145_s16   ;;  %s1683_s6 = smov %s1109_s7 }
 0x165   : > { %p14_p11 = scmp.ge.s32.totalorder %s17_s16, 6   ;;  %s1684_s7 = smov %s1113_s8 }
 0x166   : > { %s1685_s8 = smov %s1249_s29  ;;  %s1686_s9 = smov %s1121_s10 }
 0x167   : > { %s1687_s10 = smov %s1125_s11  ;;  %s1688_s11 = smov %s1252_s30 }
 0x168   : > { %s1689_s12 = smov %s1137_s14  ;;  %s1690_s13 = smov %s1141_s15 }
 0x169   : > { %s1691_s14 = smov %s1694_s19  ;;  %s1692_s15 = smov %s1698_s20 }
 0x16a   :  { %16 = sbr.rel (!%p14_p11) target bundleno = 9 (0x9), region = 81 }
 0x171   :  { %725 = vsyncpa [#allocation4], 1 }
 0x172   :  { %727 = vsyncpa [#allocation4 + $0x1], 1 }
 0x173   :  { %728 = vsyncpa [#allocation5], 1 }
 0x174   :  { %730 = vsyncpa [#allocation5 + $0x1], 1 }

</bundles_post_ra>
